<compile_context>
chip_gen: v7x
topology: tpu7x:2x2x1
jax: 0.10.0
libtpu: 0.0.40
codegen_flags: <defaults>
</compile_context>

<pallas_src>
import math

import jax
import jax.numpy as jnp
import numpy as np
from jax import lax
from jax.experimental import pallas as pl
from jax.experimental.pallas import tpu as pltpu


# ------------------------------ helpers ------------------------------------ #

def _round_up(n, m):
    return ((n + m - 1) // m) * m


def _build_ma_matrix(L, K):
    """(L, L) matrix M s.t. M @ x == replicate-padded moving average of x (AvgPool1d)."""
    front = K - 1 - (K - 1) // 2
    M = np.zeros((L, L), np.float32)
    for i in range(L):
        for j in range(i, i + K):
            c = min(max(j - front, 0), L - 1)
            M[i, c] += 1.0 / K
    return M


# ------------------------------ wrapper + fused kernel ---------------------- #

def decoder_layer_forward(x, cross, params, moving_avg_kernel=25):
    """Matches DecoderLayer.forward (eval mode, masks=None). Returns (x, residual_trend)."""
    B, L, D = x.shape
    S = cross.shape[1]
    d_ff = params["w1"].shape[1]
    c_out = params["wp"].shape[2]
    BL, BS = B * L, B * S
    PAD = max(128, _round_up(D + c_out, 128))       # lane-dense output slab width
    pad_w = PAD - D - c_out
    f32, bf16 = jnp.float32, jnp.bfloat16
    out_dtype = x.dtype
    scale = 1.0 / math.sqrt(D)

    def mm(a, b):
        # bf16 MXU operands, f32 accumulation.
        return jnp.dot(a.astype(bf16), b.astype(bf16), preferred_element_type=f32)

    def kernel(x_ref, cross_ref, ma_ref,
               wq_s_ref, wk_s_ref, wv_s_ref, wo_s_ref,
               wq_c_ref, wk_c_ref, wv_c_ref, wo_c_ref,
               w1_ref, w2_ref, wp_ref, out_ref):
        xv = x_ref[...].astype(f32)                 # (B*L, D)
        cv = cross_ref[...].astype(f32)             # (B*S, D)
        trend = jnp.zeros((BL, D), f32)

        def attend(q, k, v):
            # scores via dot_general contracting last dims of both operands
            # (no explicit k.T -> no XLU transpose / VMEM copy).
            s = lax.dot_general(q.astype(bf16), k.astype(bf16),
                                (((1,), (1,)), ((), ())),
                                preferred_element_type=f32) * scale
            s = s - jnp.max(s, axis=-1, keepdims=True)
            p = jnp.exp(s)
            p = p * pl.reciprocal(jnp.sum(p, axis=-1, keepdims=True), approx=True)
            return mm(p, v)                         # (L, D)

        def decomp(z, tr):
            # replicate-padded moving average as a block-diagonal banded bf16 matmul
            mean = mm(ma_ref[...], z)               # (B*L, D), single-pass MXU push
            return z - mean, tr + mean

        # ---- self attention + residual, decomp1 (projections fold B*L on M) ----
        q = mm(xv, wq_s_ref[...])
        k = mm(xv, wk_s_ref[...])
        v = mm(xv, wv_s_ref[...])
        ctx = jnp.concatenate(
            [attend(q[b * L:(b + 1) * L], k[b * L:(b + 1) * L], v[b * L:(b + 1) * L])
             for b in range(B)], axis=0)
        xv = xv + mm(ctx, wo_s_ref[...])
        xv, trend = decomp(xv, trend)

        # ---- cross attention + residual, decomp2 ----
        q = mm(xv, wq_c_ref[...])
        k = mm(cv, wk_c_ref[...])
        v = mm(cv, wv_c_ref[...])
        ctx = jnp.concatenate(
            [attend(q[b * L:(b + 1) * L], k[b * S:(b + 1) * S], v[b * S:(b + 1) * S])
             for b in range(B)], axis=0)
        xv = xv + mm(ctx, wo_c_ref[...])
        xv, trend = decomp(xv, trend)

        # ---- FFN: conv1(k=1) -> ReLU -> conv2(k=1), residual, decomp3 ----
        h = jnp.maximum(mm(xv, w1_ref[...]), 0.0)   # (B*L, d_ff)
        xv, trend = decomp(xv + mm(h, w2_ref[...]), trend)

        # ---- circular Conv1d(kernel_size=3, padding=1) of accumulated trend ----
        # out[l] = trend[(l-1)%L] @ wp[0] + trend[l] @ wp[1] + trend[(l+1)%L] @ wp[2]
        # done with pltpu.roll (XLU) instead of concat-of-shifted-slices.
        projs = []
        for b in range(B):
            tb = trend[b * L:(b + 1) * L]                       # (L, D)
            prev = pltpu.roll(tb, 1, 0)                         # tb[(l-1) % L]
            nxt = pltpu.roll(tb, L - 1, 0)                      # tb[(l+1) % L]
            projs.append(mm(prev, wp_ref[0]) + mm(tb, wp_ref[1]) + mm(nxt, wp_ref[2]))
        proj = jnp.concatenate(projs, axis=0)                   # (B*L, c_out)

        # ---- single lane-dense output slab: [x | trend | zero pad] ----
        parts = [xv.astype(out_dtype), proj.astype(out_dtype)]
        if pad_w > 0:
            parts.append(jnp.zeros((BL, pad_w), out_dtype))
        out_ref[...] = jnp.concatenate(parts, axis=-1)          # (B*L, PAD)

    # ---- host-side prep: bf16 weights, block-diagonal MA matrix, flat activations ----
    ma = np.kron(np.eye(B, dtype=np.float32), _build_ma_matrix(L, moving_avg_kernel))
    ma = jnp.asarray(ma, bf16)                                  # (B*L, B*L) bf16

    wq_s, wk_s, wv_s, wo_s = [w.astype(bf16) for w in params["self_attn"]]
    wq_c, wk_c, wv_c, wo_c = [w.astype(bf16) for w in params["cross_attn"]]
    w1 = params["w1"].astype(bf16)                              # (D, d_ff)
    w2 = params["w2"].astype(bf16)                              # (d_ff, D)
    wp = params["wp"].astype(bf16)                              # (3, D, c_out)

    x2d = x.reshape(BL, D)
    cross2d = cross.reshape(BS, D)

    def full(shape):
        return pl.BlockSpec(shape, lambda *_: (0,) * len(shape))

    out_slab = pl.pallas_call(
        kernel,
        out_shape=jax.ShapeDtypeStruct((BL, PAD), out_dtype),
        in_specs=[
            full((BL, D)), full((BS, D)), full((BL, BL)),
            full((D, D)), full((D, D)), full((D, D)), full((D, D)),     # self-attn
            full((D, D)), full((D, D)), full((D, D)), full((D, D)),     # cross-attn
            full((D, d_ff)), full((d_ff, D)),                           # FFN
            full((3, D, c_out)),                                        # trend projection
        ],
        out_specs=full((BL, PAD)),
    )(x2d, cross2d, ma, wq_s, wk_s, wv_s, wo_s,
      wq_c, wk_c, wv_c, wo_c, w1, w2, wp)

    out_slab = out_slab.reshape(B, L, PAD)
    return out_slab[..., :D], out_slab[..., D:D + c_out]


# ----------------------------- pure-JAX reference --------------------------- #

def _ref_forward(x, cross, params, K):
    def attn(q_in, kv_in, wq, wk, wv, wo):
        q, k, v = q_in @ wq, kv_in @ wk, kv_in @ wv
        s = jnp.einsum("bld,bsd->bls", q, k) / math.sqrt(q.shape[-1])
        a = jax.nn.softmax(s, axis=-1)
        return q_in + jnp.einsum("bls,bsd->bld", a, v) @ wo

    def decomp(z):
        front = K - 1 - (K - 1) // 2
        end = (K - 1) // 2
        zp = jnp.concatenate(
            [jnp.repeat(z[:, :1], front, 1), z, jnp.repeat(z[:, -1:], end, 1)], axis=1)
        mean = jnp.mean(jnp.stack([zp[:, j:j + z.shape[1]] for j in range(K)], 0), 0)
        return z - mean, mean

    L = x.shape[1]
    x = attn(x, x, *params["self_attn"])
    x, t1 = decomp(x)
    x = attn(x, cross, *params["cross_attn"])
    x, t2 = decomp(x)
    y = jnp.maximum(x @ params["w1"], 0.0) @ params["w2"]
    x, t3 = decomp(x + y)
    rt = t1 + t2 + t3
    rtp = jnp.concatenate([rt[:, -1:], rt, rt[:, :1]], axis=1)
    proj = sum(jnp.einsum("bld,dc->blc", rtp[:, k:k + L], params["wp"][k]) for k in range(3))
    return x, proj


# ----------------------------------- main ----------------------------------- #

if __name__ == "__main__":
    B, L, S = 2, 8, 8            # batch, target seq len, cross seq len
    D, D_FF, C_OUT = 32, 64, 16  # d_model, d_ff, c_out
    K_MA = 25                    # moving_avg kernel size (default)

    key = jax.random.PRNGKey(0)
    ks = jax.random.split(key, 12)

    def w(k, shape, scale):
        return jax.random.normal(k, shape, jnp.float32) * scale

    params = {
        "self_attn": (w(ks[0], (D, D), D ** -0.5), w(ks[1], (D, D), D ** -0.5),
                      w(ks[2], (D, D), D ** -0.5), w(ks[3], (D, D), D ** -0.5)),
        "cross_attn": (w(ks[4], (D, D), D ** -0.5), w(ks[5], (D, D), D ** -0.5),
                       w(ks[6], (D, D), D ** -0.5), w(ks[7], (D, D), D ** -0.5)),
        "w1": w(ks[8], (D, D_FF), D ** -0.5),             # conv1 (k=1), transposed
        "w2": w(ks[9], (D_FF, D), D_FF ** -0.5),          # conv2 (k=1), transposed
        "wp": w(ks[10], (3, D, C_OUT), (3 * D) ** -0.5),  # projection conv (k=3), (k, D, c_out)
    }

    x = jax.random.normal(ks[11], (B, L, D), jnp.float32)
    cross = jax.random.normal(jax.random.fold_in(key, 99), (B, S, D), jnp.float32)

    out_x, out_trend = decoder_layer_forward(x, cross, params, K_MA)
    out_x = jax.block_until_ready(out_x)
    out_trend = jax.block_until_ready(out_trend)

    ref_x, ref_trend = _ref_forward(x, cross, params, K_MA)
    # tolerance accounts for bf16 MXU operands (incl. bf16 moving-average matrix)
    # + approx reciprocal vs. the fp32 reference
    np.testing.assert_allclose(np.asarray(out_x), np.asarray(ref_x), rtol=3e-2, atol=3e-2)
    np.testing.assert_allclose(np.asarray(out_trend), np.asarray(ref_trend), rtol=3e-2, atol=3e-2)

    print("KERNEL_OK")
</pallas_src>

<mosaic_0001>
module attributes {stable_mosaic.version = 11 : i64} {
  func.func @kernel(%arg0: memref<16x32xf32, #tpu.memory_space<vmem>>, %arg1: memref<16x32xf32, #tpu.memory_space<vmem>>, %arg2: memref<16x16xbf16, #tpu.memory_space<vmem>>, %arg3: memref<32x32xbf16, #tpu.memory_space<vmem>>, %arg4: memref<32x32xbf16, #tpu.memory_space<vmem>>, %arg5: memref<32x32xbf16, #tpu.memory_space<vmem>>, %arg6: memref<32x32xbf16, #tpu.memory_space<vmem>>, %arg7: memref<32x32xbf16, #tpu.memory_space<vmem>>, %arg8: memref<32x32xbf16, #tpu.memory_space<vmem>>, %arg9: memref<32x32xbf16, #tpu.memory_space<vmem>>, %arg10: memref<32x32xbf16, #tpu.memory_space<vmem>>, %arg11: memref<32x64xbf16, #tpu.memory_space<vmem>>, %arg12: memref<64x32xbf16, #tpu.memory_space<vmem>>, %arg13: memref<3x32x16xbf16, #tpu.memory_space<vmem>>, %arg14: memref<16x128xf32, #tpu.memory_space<vmem>>) attributes {dimension_semantics = [], scalar_prefetch = 0 : i64, scratch_operands = 0 : i64, tpu.core_type = #tpu.core_type<tc>} {
    %c0 = arith.constant 0 : index
    %c0_0 = arith.constant 0 : index
    %0 = vector.load %arg0[%c0, %c0_0] : memref<16x32xf32, #tpu.memory_space<vmem>>, vector<16x32xf32>
    %c0_1 = arith.constant 0 : index
    %c0_2 = arith.constant 0 : index
    %1 = vector.load %arg1[%c0_1, %c0_2] : memref<16x32xf32, #tpu.memory_space<vmem>>, vector<16x32xf32>
    %cst = arith.constant 0.000000e+00 : f32
    %2 = vector.broadcast %cst : f32 to vector<16x32xf32>
    %c0_3 = arith.constant 0 : index
    %c0_4 = arith.constant 0 : index
    %3 = vector.load %arg3[%c0_3, %c0_4] : memref<32x32xbf16, #tpu.memory_space<vmem>>, vector<32x32xbf16>
    %4 = arith.truncf %0 : vector<16x32xf32> to vector<16x32xbf16>
    %cst_5 = arith.constant dense<0.000000e+00> : vector<16x32xf32>
    %5 = tpu.matmul %4, %3, %cst_5 {dimension_numbers = #tpu.dot_dimension_numbers<[1], [0], [0], [1], [0, 0, 1, 1], [], []>} : vector<16x32xbf16>, vector<32x32xbf16>, vector<16x32xf32> -> vector<16x32xf32>
    %c0_6 = arith.constant 0 : index
    %c0_7 = arith.constant 0 : index
    %6 = vector.load %arg4[%c0_6, %c0_7] : memref<32x32xbf16, #tpu.memory_space<vmem>>, vector<32x32xbf16>
    %7 = arith.truncf %0 : vector<16x32xf32> to vector<16x32xbf16>
    %cst_8 = arith.constant dense<0.000000e+00> : vector<16x32xf32>
    %8 = tpu.matmul %7, %6, %cst_8 {dimension_numbers = #tpu.dot_dimension_numbers<[1], [0], [0], [1], [0, 0, 1, 1], [], []>} : vector<16x32xbf16>, vector<32x32xbf16>, vector<16x32xf32> -> vector<16x32xf32>
    %c0_9 = arith.constant 0 : index
    %c0_10 = arith.constant 0 : index
    %9 = vector.load %arg5[%c0_9, %c0_10] : memref<32x32xbf16, #tpu.memory_space<vmem>>, vector<32x32xbf16>
    %10 = arith.truncf %0 : vector<16x32xf32> to vector<16x32xbf16>
    %cst_11 = arith.constant dense<0.000000e+00> : vector<16x32xf32>
    %11 = tpu.matmul %10, %9, %cst_11 {dimension_numbers = #tpu.dot_dimension_numbers<[1], [0], [0], [1], [0, 0, 1, 1], [], []>} : vector<16x32xbf16>, vector<32x32xbf16>, vector<16x32xf32> -> vector<16x32xf32>
    %12 = vector.extract_strided_slice %5 {offsets = [0, 0], sizes = [8, 32], strides = [1, 1]} : vector<16x32xf32> to vector<8x32xf32>
    %13 = vector.extract_strided_slice %8 {offsets = [0, 0], sizes = [8, 32], strides = [1, 1]} : vector<16x32xf32> to vector<8x32xf32>
    %14 = vector.extract_strided_slice %11 {offsets = [0, 0], sizes = [8, 32], strides = [1, 1]} : vector<16x32xf32> to vector<8x32xf32>
    %15 = arith.truncf %12 : vector<8x32xf32> to vector<8x32xbf16>
    %16 = arith.truncf %13 : vector<8x32xf32> to vector<8x32xbf16>
    %cst_12 = arith.constant dense<0.000000e+00> : vector<8x8xf32>
    %17 = tpu.matmul %15, %16, %cst_12 {dimension_numbers = #tpu.dot_dimension_numbers<[1], [1], [0], [0], [0, 0, 1, 0], [], []>} : vector<8x32xbf16>, vector<8x32xbf16>, vector<8x8xf32> -> vector<8x8xf32>
    %cst_13 = arith.constant 0.176776692 : f32
    %18 = vector.broadcast %cst_13 : f32 to vector<8x8xf32>
    %19 = arith.mulf %17, %18 : vector<8x8xf32>
    %cst_14 = arith.constant dense<0xFF800000> : vector<8xf32>
    %20 = vector.multi_reduction <maximumf>, %19, %cst_14 [1] : vector<8x8xf32> to vector<8xf32>
    %21 = vector.shape_cast %20 : vector<8xf32> to vector<8x1xf32>
    %22 = vector.broadcast %21 : vector<8x1xf32> to vector<8x8xf32>
    %23 = arith.subf %19, %22 : vector<8x8xf32>
    %24 = math.exp %23 : vector<8x8xf32>
    %cst_15 = arith.constant dense<0.000000e+00> : vector<8xf32>
    %25 = vector.multi_reduction <add>, %24, %cst_15 [1] : vector<8x8xf32> to vector<8xf32>
    %26 = vector.shape_cast %25 : vector<8xf32> to vector<8x1xf32>
    %27 = tpu.reciprocal %26 {approx = true} : vector<8x1xf32> -> vector<8x1xf32>
    %28 = vector.broadcast %27 : vector<8x1xf32> to vector<8x8xf32>
    %29 = arith.mulf %24, %28 : vector<8x8xf32>
    %30 = arith.truncf %29 : vector<8x8xf32> to vector<8x8xbf16>
    %31 = arith.truncf %14 : vector<8x32xf32> to vector<8x32xbf16>
    %cst_16 = arith.constant dense<0.000000e+00> : vector<8x32xf32>
    %32 = tpu.matmul %30, %31, %cst_16 {dimension_numbers = #tpu.dot_dimension_numbers<[1], [0], [0], [1], [0, 0, 1, 1], [], []>} : vector<8x8xbf16>, vector<8x32xbf16>, vector<8x32xf32> -> vector<8x32xf32>
    %33 = vector.extract_strided_slice %5 {offsets = [8, 0], sizes = [8, 32], strides = [1, 1]} : vector<16x32xf32> to vector<8x32xf32>
    %34 = vector.extract_strided_slice %8 {offsets = [8, 0], sizes = [8, 32], strides = [1, 1]} : vector<16x32xf32> to vector<8x32xf32>
    %35 = vector.extract_strided_slice %11 {offsets = [8, 0], sizes = [8, 32], strides = [1, 1]} : vector<16x32xf32> to vector<8x32xf32>
    %36 = arith.truncf %33 : vector<8x32xf32> to vector<8x32xbf16>
    %37 = arith.truncf %34 : vector<8x32xf32> to vector<8x32xbf16>
    %cst_17 = arith.constant dense<0.000000e+00> : vector<8x8xf32>
    %38 = tpu.matmul %36, %37, %cst_17 {dimension_numbers = #tpu.dot_dimension_numbers<[1], [1], [0], [0], [0, 0, 1, 0], [], []>} : vector<8x32xbf16>, vector<8x32xbf16>, vector<8x8xf32> -> vector<8x8xf32>
    %cst_18 = arith.constant 0.176776692 : f32
    %39 = vector.broadcast %cst_18 : f32 to vector<8x8xf32>
    %40 = arith.mulf %38, %39 : vector<8x8xf32>
    %cst_19 = arith.constant dense<0xFF800000> : vector<8xf32>
    %41 = vector.multi_reduction <maximumf>, %40, %cst_19 [1] : vector<8x8xf32> to vector<8xf32>
    %42 = vector.shape_cast %41 : vector<8xf32> to vector<8x1xf32>
    %43 = vector.broadcast %42 : vector<8x1xf32> to vector<8x8xf32>
    %44 = arith.subf %40, %43 : vector<8x8xf32>
    %45 = math.exp %44 : vector<8x8xf32>
    %cst_20 = arith.constant dense<0.000000e+00> : vector<8xf32>
    %46 = vector.multi_reduction <add>, %45, %cst_20 [1] : vector<8x8xf32> to vector<8xf32>
    %47 = vector.shape_cast %46 : vector<8xf32> to vector<8x1xf32>
    %48 = tpu.reciprocal %47 {approx = true} : vector<8x1xf32> -> vector<8x1xf32>
    %49 = vector.broadcast %48 : vector<8x1xf32> to vector<8x8xf32>
    %50 = arith.mulf %45, %49 : vector<8x8xf32>
    %51 = arith.truncf %50 : vector<8x8xf32> to vector<8x8xbf16>
    %52 = arith.truncf %35 : vector<8x32xf32> to vector<8x32xbf16>
    %cst_21 = arith.constant dense<0.000000e+00> : vector<8x32xf32>
    %53 = tpu.matmul %51, %52, %cst_21 {dimension_numbers = #tpu.dot_dimension_numbers<[1], [0], [0], [1], [0, 0, 1, 1], [], []>} : vector<8x8xbf16>, vector<8x32xbf16>, vector<8x32xf32> -> vector<8x32xf32>
    %54 = tpu.concatenate %32, %53 in 0 : vector<8x32xf32>, vector<8x32xf32> -> vector<16x32xf32>
    %c0_22 = arith.constant 0 : index
    %c0_23 = arith.constant 0 : index
    %55 = vector.load %arg6[%c0_22, %c0_23] : memref<32x32xbf16, #tpu.memory_space<vmem>>, vector<32x32xbf16>
    %56 = arith.truncf %54 : vector<16x32xf32> to vector<16x32xbf16>
    %cst_24 = arith.constant dense<0.000000e+00> : vector<16x32xf32>
    %57 = tpu.matmul %56, %55, %cst_24 {dimension_numbers = #tpu.dot_dimension_numbers<[1], [0], [0], [1], [0, 0, 1, 1], [], []>} : vector<16x32xbf16>, vector<32x32xbf16>, vector<16x32xf32> -> vector<16x32xf32>
    %58 = arith.addf %0, %57 : vector<16x32xf32>
    %c0_25 = arith.constant 0 : index
    %c0_26 = arith.constant 0 : index
    %59 = vector.load %arg2[%c0_25, %c0_26] : memref<16x16xbf16, #tpu.memory_space<vmem>>, vector<16x16xbf16>
    %60 = arith.truncf %58 : vector<16x32xf32> to vector<16x32xbf16>
    %cst_27 = arith.constant dense<0.000000e+00> : vector<16x32xf32>
    %61 = tpu.matmul %59, %60, %cst_27 {dimension_numbers = #tpu.dot_dimension_numbers<[1], [0], [0], [1], [0, 0, 1, 1], [], []>} : vector<16x16xbf16>, vector<16x32xbf16>, vector<16x32xf32> -> vector<16x32xf32>
    %62 = arith.subf %58, %61 : vector<16x32xf32>
    %63 = arith.addf %2, %61 : vector<16x32xf32>
    %c0_28 = arith.constant 0 : index
    %c0_29 = arith.constant 0 : index
    %64 = vector.load %arg7[%c0_28, %c0_29] : memref<32x32xbf16, #tpu.memory_space<vmem>>, vector<32x32xbf16>
    %65 = arith.truncf %62 : vector<16x32xf32> to vector<16x32xbf16>
    %cst_30 = arith.constant dense<0.000000e+00> : vector<16x32xf32>
    %66 = tpu.matmul %65, %64, %cst_30 {dimension_numbers = #tpu.dot_dimension_numbers<[1], [0], [0], [1], [0, 0, 1, 1], [], []>} : vector<16x32xbf16>, vector<32x32xbf16>, vector<16x32xf32> -> vector<16x32xf32>
    %c0_31 = arith.constant 0 : index
    %c0_32 = arith.constant 0 : index
    %67 = vector.load %arg8[%c0_31, %c0_32] : memref<32x32xbf16, #tpu.memory_space<vmem>>, vector<32x32xbf16>
    %68 = arith.truncf %1 : vector<16x32xf32> to vector<16x32xbf16>
    %cst_33 = arith.constant dense<0.000000e+00> : vector<16x32xf32>
    %69 = tpu.matmul %68, %67, %cst_33 {dimension_numbers = #tpu.dot_dimension_numbers<[1], [0], [0], [1], [0, 0, 1, 1], [], []>} : vector<16x32xbf16>, vector<32x32xbf16>, vector<16x32xf32> -> vector<16x32xf32>
    %c0_34 = arith.constant 0 : index
    %c0_35 = arith.constant 0 : index
    %70 = vector.load %arg9[%c0_34, %c0_35] : memref<32x32xbf16, #tpu.memory_space<vmem>>, vector<32x32xbf16>
    %71 = arith.truncf %1 : vector<16x32xf32> to vector<16x32xbf16>
    %cst_36 = arith.constant dense<0.000000e+00> : vector<16x32xf32>
    %72 = tpu.matmul %71, %70, %cst_36 {dimension_numbers = #tpu.dot_dimension_numbers<[1], [0], [0], [1], [0, 0, 1, 1], [], []>} : vector<16x32xbf16>, vector<32x32xbf16>, vector<16x32xf32> -> vector<16x32xf32>
    %73 = vector.extract_strided_slice %66 {offsets = [0, 0], sizes = [8, 32], strides = [1, 1]} : vector<16x32xf32> to vector<8x32xf32>
    %74 = vector.extract_strided_slice %69 {offsets = [0, 0], sizes = [8, 32], strides = [1, 1]} : vector<16x32xf32> to vector<8x32xf32>
    %75 = vector.extract_strided_slice %72 {offsets = [0, 0], sizes = [8, 32], strides = [1, 1]} : vector<16x32xf32> to vector<8x32xf32>
    %76 = arith.truncf %73 : vector<8x32xf32> to vector<8x32xbf16>
    %77 = arith.truncf %74 : vector<8x32xf32> to vector<8x32xbf16>
    %cst_37 = arith.constant dense<0.000000e+00> : vector<8x8xf32>
    %78 = tpu.matmul %76, %77, %cst_37 {dimension_numbers = #tpu.dot_dimension_numbers<[1], [1], [0], [0], [0, 0, 1, 0], [], []>} : vector<8x32xbf16>, vector<8x32xbf16>, vector<8x8xf32> -> vector<8x8xf32>
    %cst_38 = arith.constant 0.176776692 : f32
    %79 = vector.broadcast %cst_38 : f32 to vector<8x8xf32>
    %80 = arith.mulf %78, %79 : vector<8x8xf32>
    %cst_39 = arith.constant dense<0xFF800000> : vector<8xf32>
    %81 = vector.multi_reduction <maximumf>, %80, %cst_39 [1] : vector<8x8xf32> to vector<8xf32>
    %82 = vector.shape_cast %81 : vector<8xf32> to vector<8x1xf32>
    %83 = vector.broadcast %82 : vector<8x1xf32> to vector<8x8xf32>
    %84 = arith.subf %80, %83 : vector<8x8xf32>
    %85 = math.exp %84 : vector<8x8xf32>
    %cst_40 = arith.constant dense<0.000000e+00> : vector<8xf32>
    %86 = vector.multi_reduction <add>, %85, %cst_40 [1] : vector<8x8xf32> to vector<8xf32>
    %87 = vector.shape_cast %86 : vector<8xf32> to vector<8x1xf32>
    %88 = tpu.reciprocal %87 {approx = true} : vector<8x1xf32> -> vector<8x1xf32>
    %89 = vector.broadcast %88 : vector<8x1xf32> to vector<8x8xf32>
    %90 = arith.mulf %85, %89 : vector<8x8xf32>
    %91 = arith.truncf %90 : vector<8x8xf32> to vector<8x8xbf16>
    %92 = arith.truncf %75 : vector<8x32xf32> to vector<8x32xbf16>
    %cst_41 = arith.constant dense<0.000000e+00> : vector<8x32xf32>
    %93 = tpu.matmul %91, %92, %cst_41 {dimension_numbers = #tpu.dot_dimension_numbers<[1], [0], [0], [1], [0, 0, 1, 1], [], []>} : vector<8x8xbf16>, vector<8x32xbf16>, vector<8x32xf32> -> vector<8x32xf32>
    %94 = vector.extract_strided_slice %66 {offsets = [8, 0], sizes = [8, 32], strides = [1, 1]} : vector<16x32xf32> to vector<8x32xf32>
    %95 = vector.extract_strided_slice %69 {offsets = [8, 0], sizes = [8, 32], strides = [1, 1]} : vector<16x32xf32> to vector<8x32xf32>
    %96 = vector.extract_strided_slice %72 {offsets = [8, 0], sizes = [8, 32], strides = [1, 1]} : vector<16x32xf32> to vector<8x32xf32>
    %97 = arith.truncf %94 : vector<8x32xf32> to vector<8x32xbf16>
    %98 = arith.truncf %95 : vector<8x32xf32> to vector<8x32xbf16>
    %cst_42 = arith.constant dense<0.000000e+00> : vector<8x8xf32>
    %99 = tpu.matmul %97, %98, %cst_42 {dimension_numbers = #tpu.dot_dimension_numbers<[1], [1], [0], [0], [0, 0, 1, 0], [], []>} : vector<8x32xbf16>, vector<8x32xbf16>, vector<8x8xf32> -> vector<8x8xf32>
    %cst_43 = arith.constant 0.176776692 : f32
    %100 = vector.broadcast %cst_43 : f32 to vector<8x8xf32>
    %101 = arith.mulf %99, %100 : vector<8x8xf32>
    %cst_44 = arith.constant dense<0xFF800000> : vector<8xf32>
    %102 = vector.multi_reduction <maximumf>, %101, %cst_44 [1] : vector<8x8xf32> to vector<8xf32>
    %103 = vector.shape_cast %102 : vector<8xf32> to vector<8x1xf32>
    %104 = vector.broadcast %103 : vector<8x1xf32> to vector<8x8xf32>
    %105 = arith.subf %101, %104 : vector<8x8xf32>
    %106 = math.exp %105 : vector<8x8xf32>
    %cst_45 = arith.constant dense<0.000000e+00> : vector<8xf32>
    %107 = vector.multi_reduction <add>, %106, %cst_45 [1] : vector<8x8xf32> to vector<8xf32>
    %108 = vector.shape_cast %107 : vector<8xf32> to vector<8x1xf32>
    %109 = tpu.reciprocal %108 {approx = true} : vector<8x1xf32> -> vector<8x1xf32>
    %110 = vector.broadcast %109 : vector<8x1xf32> to vector<8x8xf32>
    %111 = arith.mulf %106, %110 : vector<8x8xf32>
    %112 = arith.truncf %111 : vector<8x8xf32> to vector<8x8xbf16>
    %113 = arith.truncf %96 : vector<8x32xf32> to vector<8x32xbf16>
    %cst_46 = arith.constant dense<0.000000e+00> : vector<8x32xf32>
    %114 = tpu.matmul %112, %113, %cst_46 {dimension_numbers = #tpu.dot_dimension_numbers<[1], [0], [0], [1], [0, 0, 1, 1], [], []>} : vector<8x8xbf16>, vector<8x32xbf16>, vector<8x32xf32> -> vector<8x32xf32>
    %115 = tpu.concatenate %93, %114 in 0 : vector<8x32xf32>, vector<8x32xf32> -> vector<16x32xf32>
    %c0_47 = arith.constant 0 : index
    %c0_48 = arith.constant 0 : index
    %116 = vector.load %arg10[%c0_47, %c0_48] : memref<32x32xbf16, #tpu.memory_space<vmem>>, vector<32x32xbf16>
    %117 = arith.truncf %115 : vector<16x32xf32> to vector<16x32xbf16>
    %cst_49 = arith.constant dense<0.000000e+00> : vector<16x32xf32>
    %118 = tpu.matmul %117, %116, %cst_49 {dimension_numbers = #tpu.dot_dimension_numbers<[1], [0], [0], [1], [0, 0, 1, 1], [], []>} : vector<16x32xbf16>, vector<32x32xbf16>, vector<16x32xf32> -> vector<16x32xf32>
    %119 = arith.addf %62, %118 : vector<16x32xf32>
    %c0_50 = arith.constant 0 : index
    %c0_51 = arith.constant 0 : index
    %120 = vector.load %arg2[%c0_50, %c0_51] : memref<16x16xbf16, #tpu.memory_space<vmem>>, vector<16x16xbf16>
    %121 = arith.truncf %119 : vector<16x32xf32> to vector<16x32xbf16>
    %cst_52 = arith.constant dense<0.000000e+00> : vector<16x32xf32>
    %122 = tpu.matmul %120, %121, %cst_52 {dimension_numbers = #tpu.dot_dimension_numbers<[1], [0], [0], [1], [0, 0, 1, 1], [], []>} : vector<16x16xbf16>, vector<16x32xbf16>, vector<16x32xf32> -> vector<16x32xf32>
    %123 = arith.subf %119, %122 : vector<16x32xf32>
    %124 = arith.addf %63, %122 : vector<16x32xf32>
    %c0_53 = arith.constant 0 : index
    %c0_54 = arith.constant 0 : index
    %125 = vector.load %arg11[%c0_53, %c0_54] : memref<32x64xbf16, #tpu.memory_space<vmem>>, vector<32x64xbf16>
    %126 = arith.truncf %123 : vector<16x32xf32> to vector<16x32xbf16>
    %cst_55 = arith.constant dense<0.000000e+00> : vector<16x64xf32>
    %127 = tpu.matmul %126, %125, %cst_55 {dimension_numbers = #tpu.dot_dimension_numbers<[1], [0], [0], [1], [0, 0, 1, 1], [], []>} : vector<16x32xbf16>, vector<32x64xbf16>, vector<16x64xf32> -> vector<16x64xf32>
    %cst_56 = arith.constant 0.000000e+00 : f32
    %128 = vector.broadcast %cst_56 : f32 to vector<16x64xf32>
    %129 = arith.maximumf %127, %128 : vector<16x64xf32>
    %c0_57 = arith.constant 0 : index
    %c0_58 = arith.constant 0 : index
    %130 = vector.load %arg12[%c0_57, %c0_58] : memref<64x32xbf16, #tpu.memory_space<vmem>>, vector<64x32xbf16>
    %131 = arith.truncf %129 : vector<16x64xf32> to vector<16x64xbf16>
    %cst_59 = arith.constant dense<0.000000e+00> : vector<16x32xf32>
    %132 = tpu.matmul %131, %130, %cst_59 {dimension_numbers = #tpu.dot_dimension_numbers<[1], [0], [0], [1], [0, 0, 1, 1], [], []>} : vector<16x64xbf16>, vector<64x32xbf16>, vector<16x32xf32> -> vector<16x32xf32>
    %133 = arith.addf %123, %132 : vector<16x32xf32>
    %c0_60 = arith.constant 0 : index
    %c0_61 = arith.constant 0 : index
    %134 = vector.load %arg2[%c0_60, %c0_61] : memref<16x16xbf16, #tpu.memory_space<vmem>>, vector<16x16xbf16>
    %135 = arith.truncf %133 : vector<16x32xf32> to vector<16x32xbf16>
    %cst_62 = arith.constant dense<0.000000e+00> : vector<16x32xf32>
    %136 = tpu.matmul %134, %135, %cst_62 {dimension_numbers = #tpu.dot_dimension_numbers<[1], [0], [0], [1], [0, 0, 1, 1], [], []>} : vector<16x16xbf16>, vector<16x32xbf16>, vector<16x32xf32> -> vector<16x32xf32>
    %137 = arith.subf %133, %136 : vector<16x32xf32>
    %138 = arith.addf %124, %136 : vector<16x32xf32>
    %139 = vector.extract_strided_slice %138 {offsets = [0, 0], sizes = [8, 32], strides = [1, 1]} : vector<16x32xf32> to vector<8x32xf32>
    %c1_i32 = arith.constant 1 : i32
    %140 = tpu.dynamic_rotate %139 by %c1_i32 dim 0 : vector<8x32xf32>, i32 -> vector<8x32xf32>
    %c7_i32 = arith.constant 7 : i32
    %141 = tpu.dynamic_rotate %139 by %c7_i32 dim 0 : vector<8x32xf32>, i32 -> vector<8x32xf32>
    %c0_63 = arith.constant 0 : index
    %c0_64 = arith.constant 0 : index
    %c0_65 = arith.constant 0 : index
    %142 = vector.load %arg13[%c0_63, %c0_64, %c0_65] : memref<3x32x16xbf16, #tpu.memory_space<vmem>>, vector<1x32x16xbf16>
    %143 = vector.shape_cast %142 : vector<1x32x16xbf16> to vector<32x16xbf16>
    %144 = arith.truncf %140 : vector<8x32xf32> to vector<8x32xbf16>
    %cst_66 = arith.constant dense<0.000000e+00> : vector<8x16xf32>
    %145 = tpu.matmul %144, %143, %cst_66 {dimension_numbers = #tpu.dot_dimension_numbers<[1], [0], [0], [1], [0, 0, 1, 1], [], []>} : vector<8x32xbf16>, vector<32x16xbf16>, vector<8x16xf32> -> vector<8x16xf32>
    %c1 = arith.constant 1 : index
    %c0_67 = arith.constant 0 : index
    %c0_68 = arith.constant 0 : index
    %146 = vector.load %arg13[%c1, %c0_67, %c0_68] : memref<3x32x16xbf16, #tpu.memory_space<vmem>>, vector<1x32x16xbf16>
    %147 = vector.shape_cast %146 : vector<1x32x16xbf16> to vector<32x16xbf16>
    %148 = arith.truncf %139 : vector<8x32xf32> to vector<8x32xbf16>
    %cst_69 = arith.constant dense<0.000000e+00> : vector<8x16xf32>
    %149 = tpu.matmul %148, %147, %cst_69 {dimension_numbers = #tpu.dot_dimension_numbers<[1], [0], [0], [1], [0, 0, 1, 1], [], []>} : vector<8x32xbf16>, vector<32x16xbf16>, vector<8x16xf32> -> vector<8x16xf32>
    %150 = arith.addf %145, %149 : vector<8x16xf32>
    %c2 = arith.constant 2 : index
    %c0_70 = arith.constant 0 : index
    %c0_71 = arith.constant 0 : index
    %151 = vector.load %arg13[%c2, %c0_70, %c0_71] : memref<3x32x16xbf16, #tpu.memory_space<vmem>>, vector<1x32x16xbf16>
    %152 = vector.shape_cast %151 : vector<1x32x16xbf16> to vector<32x16xbf16>
    %153 = arith.truncf %141 : vector<8x32xf32> to vector<8x32xbf16>
    %cst_72 = arith.constant dense<0.000000e+00> : vector<8x16xf32>
    %154 = tpu.matmul %153, %152, %cst_72 {dimension_numbers = #tpu.dot_dimension_numbers<[1], [0], [0], [1], [0, 0, 1, 1], [], []>} : vector<8x32xbf16>, vector<32x16xbf16>, vector<8x16xf32> -> vector<8x16xf32>
    %155 = arith.addf %150, %154 : vector<8x16xf32>
    %156 = vector.extract_strided_slice %138 {offsets = [8, 0], sizes = [8, 32], strides = [1, 1]} : vector<16x32xf32> to vector<8x32xf32>
    %c1_i32_73 = arith.constant 1 : i32
    %157 = tpu.dynamic_rotate %156 by %c1_i32_73 dim 0 : vector<8x32xf32>, i32 -> vector<8x32xf32>
    %c7_i32_74 = arith.constant 7 : i32
    %158 = tpu.dynamic_rotate %156 by %c7_i32_74 dim 0 : vector<8x32xf32>, i32 -> vector<8x32xf32>
    %c0_75 = arith.constant 0 : index
    %c0_76 = arith.constant 0 : index
    %c0_77 = arith.constant 0 : index
    %159 = vector.load %arg13[%c0_75, %c0_76, %c0_77] : memref<3x32x16xbf16, #tpu.memory_space<vmem>>, vector<1x32x16xbf16>
    %160 = vector.shape_cast %159 : vector<1x32x16xbf16> to vector<32x16xbf16>
    %161 = arith.truncf %157 : vector<8x32xf32> to vector<8x32xbf16>
    %cst_78 = arith.constant dense<0.000000e+00> : vector<8x16xf32>
    %162 = tpu.matmul %161, %160, %cst_78 {dimension_numbers = #tpu.dot_dimension_numbers<[1], [0], [0], [1], [0, 0, 1, 1], [], []>} : vector<8x32xbf16>, vector<32x16xbf16>, vector<8x16xf32> -> vector<8x16xf32>
    %c1_79 = arith.constant 1 : index
    %c0_80 = arith.constant 0 : index
    %c0_81 = arith.constant 0 : index
    %163 = vector.load %arg13[%c1_79, %c0_80, %c0_81] : memref<3x32x16xbf16, #tpu.memory_space<vmem>>, vector<1x32x16xbf16>
    %164 = vector.shape_cast %163 : vector<1x32x16xbf16> to vector<32x16xbf16>
    %165 = arith.truncf %156 : vector<8x32xf32> to vector<8x32xbf16>
    %cst_82 = arith.constant dense<0.000000e+00> : vector<8x16xf32>
    %166 = tpu.matmul %165, %164, %cst_82 {dimension_numbers = #tpu.dot_dimension_numbers<[1], [0], [0], [1], [0, 0, 1, 1], [], []>} : vector<8x32xbf16>, vector<32x16xbf16>, vector<8x16xf32> -> vector<8x16xf32>
    %167 = arith.addf %162, %166 : vector<8x16xf32>
    %c2_83 = arith.constant 2 : index
    %c0_84 = arith.constant 0 : index
    %c0_85 = arith.constant 0 : index
    %168 = vector.load %arg13[%c2_83, %c0_84, %c0_85] : memref<3x32x16xbf16, #tpu.memory_space<vmem>>, vector<1x32x16xbf16>
    %169 = vector.shape_cast %168 : vector<1x32x16xbf16> to vector<32x16xbf16>
    %170 = arith.truncf %158 : vector<8x32xf32> to vector<8x32xbf16>
    %cst_86 = arith.constant dense<0.000000e+00> : vector<8x16xf32>
    %171 = tpu.matmul %170, %169, %cst_86 {dimension_numbers = #tpu.dot_dimension_numbers<[1], [0], [0], [1], [0, 0, 1, 1], [], []>} : vector<8x32xbf16>, vector<32x16xbf16>, vector<8x16xf32> -> vector<8x16xf32>
    %172 = arith.addf %167, %171 : vector<8x16xf32>
    %173 = tpu.concatenate %155, %172 in 0 : vector<8x16xf32>, vector<8x16xf32> -> vector<16x16xf32>
    %cst_87 = arith.constant 0.000000e+00 : f32
    %174 = vector.broadcast %cst_87 : f32 to vector<16x80xf32>
    %175 = tpu.concatenate %137, %173, %174 in 1 : vector<16x32xf32>, vector<16x16xf32>, vector<16x80xf32> -> vector<16x128xf32>
    %c0_88 = arith.constant 0 : index
    %c0_89 = arith.constant 0 : index
    %176 = vector.load %arg14[%c0_88, %c0_89] : memref<16x128xf32, #tpu.memory_space<vmem>>, vector<16x128xf32>
    tpu.vector_store %arg14[%c0_88, %c0_89], %175 {strides = array<i32>} : memref<16x128xf32, #tpu.memory_space<vmem>>, vector<16x128xf32>,
    return
  }
}

</mosaic_0001>

<bundles_post_ra>
// kernel: tpu_custom_call.1
= control target key start
LH: loop header
LB: loop body
LE: loop exit
PB: predicated region body
PF: predicated region fallthrough
CT: control target
= control target key end

     0   :  { %19 = vsyncpa [#allocation3], 0  ;;  %s2675_s0 = inlined_call_operand.vmem [shape: f32[16,32], index: 0, kind: input, shape index: {}]   ;;  %s2676_s1 = inlined_call_operand.vmem [shape: f32[16,32], index: 1, kind: input, shape index: {}]   ;;  %s2677_s2 = inlined_call_operand.hbm [shape: bf16[16,16], index: 2, kind: input, shape index: {}]   ;;  %s2678_s3 = inlined_call_operand.vmem [shape: bf16[32,32], index: 3, kind: input, shape index: {}]   ;;  %s2679_s4 = inlined_call_operand.vmem [shape: bf16[32,32], index: 4, kind: input, shape index: {}]   ;;  %s2680_s5 = inlined_call_operand.vmem [shape: bf16[32,32], index: 5, kind: input, shape index: {}]   ;;  %s2681_s6 = inlined_call_operand.vmem [shape: bf16[32,32], index: 6, kind: input, shape index: {}]   ;;  %s2682_s7 = inlined_call_operand.hbm [shape: bf16[32,32], index: 7, kind: input, shape index: {}]   ;;  %s2683_s8 = inlined_call_operand.hbm [shape: bf16[32,32], index: 8, kind: input, shape index: {}]   ;;  %s2684_s9 = inlined_call_operand.vmem [shape: bf16[32,32], index: 9, kind: input, shape index: {}]   ;;  %s2685_s10 = inlined_call_operand.hbm [shape: bf16[32,32], index: 10, kind: input, shape index: {}]   ;;  %s2686_s11 = inlined_call_operand.hbm [shape: bf16[32,64], index: 11, kind: input, shape index: {}]   ;;  %s2687_s12 = inlined_call_operand.vmem [shape: bf16[64,32], index: 12, kind: input, shape index: {}]   ;;  %s2688_s13 = inlined_call_operand.vmem [shape: bf16[3,32,16], index: 13, kind: input, shape index: {}]   ;;  %s2689_s14 = inlined_call_operand.hbm [shape: f32[16,128], index: 14, kind: output, shape index: {}]  }
   0x1   :  { %20 = vsyncpa [#allocation6], 0 }
   0x2   :  { %21 = vsyncpa [#allocation9], 0 }
   0x3   :  { %22 = vsyncpa [#allocation4], 0  ;;  %s2230_s29 = smov [#allocation5]   ;;  %s2231_s15 = smov [#allocation8]  }
   0x4   :  { %s52_s30 = sshll.u32 %s2230_s29, 4  ;;  %s78_s16 = sshll.u32 %s2231_s15, 4  ;;  %s53_s30 = int_to_ptr.vmem [resolvable:$true] %s52_s30  ;;  %s2318_s16 = int_to_ptr.vmem [resolvable:$true] %s78_s16 }
   0x5   :  { %s2090_s19 = scalar_lea.hbm %s2682_s7, 256 }
   0x6   :  { %p2091_p0 = scmp.ne.s32.totalorder %s2682_s7, %s2090_s19  ;;  %p2094_p1 = scmp.lt.u32.totalorder %s2090_s19, %s2682_s7 }
   0x8   :  { %p2096_p2 = pnand %p2094_p1, %p2091_p0 }
   0xa   :  { %2099 = shalt.err (!%p2096_p2)
}
   0xb   :  { %s2100_s24 = scalar_lea.vmem %s53_s30, 256  ;;  %p2105_p4 = scmp.lt.s32.totalorder %s53_s30, %s53_s30 }
   0xc   :  { %p2101_p3 = scmp.ne.s32.totalorder %s53_s30, %s2100_s24  ;;  %p2106_p5 = scmp.lt.s32.totalorder %s2100_s24, %s2100_s24 }
   0xe   :  { %p2107_p6 = por %p2106_p5, %p2105_p4 }
  0x10   :  { %p2108_p7 = pnand %p2107_p6, %p2101_p3 }
  0x12   :  { %2111 = shalt.err (!%p2108_p7)
}
  0x13   :  { %s2232_s25 = smov 64   ;;  %s2233_s26 = smov 4  }
  0x14   :  { %58 = dma.hbm_to_vmem [thread:$0]  %s2682_s7, 256, %s53_s30, [#allocation6], %s2232_s25, %s2232_s25, %s2233_s26  }
  0x15   :  { %s2112_s17 = scalar_lea.hbm %s2685_s10, 256 }
  0x16   :  { %p2113_p8 = scmp.ne.s32.totalorder %s2685_s10, %s2112_s17  ;;  %p2116_p9 = scmp.lt.u32.totalorder %s2112_s17, %s2685_s10 }
  0x18   :  { %p2118_p10 = pnand %p2116_p9, %p2113_p8 }
  0x1a   :  { %2121 = shalt.err (!%p2118_p10)
}
  0x1b   :  { %s2122_s22 = scalar_lea.vmem %s2318_s16, 256  ;;  %p2127_p12 = scmp.lt.s32.totalorder %s2318_s16, %s2318_s16 }
  0x1c   :  { %p2123_p11 = scmp.ne.s32.totalorder %s2318_s16, %s2122_s22  ;;  %p2128_p13 = scmp.lt.s32.totalorder %s2122_s22, %s2122_s22 }
  0x1e   :  { %p2129_p0 = por %p2128_p13, %p2127_p12 }
  0x20   :  { %p2130_p1 = pnand %p2129_p0, %p2123_p11 }
  0x22   :  { %2133 = shalt.err (!%p2130_p1)
}
  0x23   :  { %84 = dma.hbm_to_vmem [thread:$0]  %s2685_s10, 256, %s2318_s16, [#allocation9], %s2232_s25, %s2232_s25, %s2233_s26  }
  0x24   :  { %s2234_s23 = smov [#allocation2]   ;;  %s2235_s27 = smov [#allocation7]  }
  0x25   :  { %s32_s24 = sshll.u32 %s2234_s23, 4  ;;  %s64_s28 = sshll.u32 %s2235_s27, 4  ;;  %s33_s24 = int_to_ptr.vmem [resolvable:$true] %s32_s24  ;;  %s2355_s28 = int_to_ptr.vmem [resolvable:$true] %s64_s28 }
  0x26   :  { %s2134_s17 = scalar_lea.hbm %s2677_s2, 128 }
  0x27   :  { %p2135_p2 = scmp.ne.s32.totalorder %s2677_s2, %s2134_s17  ;;  %p2138_p3 = scmp.lt.u32.totalorder %s2134_s17, %s2677_s2 }
  0x29   :  { %p2140_p4 = pnand %p2138_p3, %p2135_p2 }
  0x2b   :  { %2143 = shalt.err (!%p2140_p4)
}
  0x2c   :  { %s2144_s10 = scalar_lea.vmem %s33_s24, 128  ;;  %p2149_p6 = scmp.lt.s32.totalorder %s33_s24, %s33_s24 }
  0x2d   :  { %p2145_p5 = scmp.ne.s32.totalorder %s33_s24, %s2144_s10  ;;  %p2150_p7 = scmp.lt.s32.totalorder %s2144_s10, %s2144_s10 }
  0x2f   :  { %p2151_p8 = por %p2150_p7, %p2149_p6 }
  0x31   :  { %p2152_p9 = pnand %p2151_p8, %p2145_p5 }
  0x33   :  { %2155 = shalt.err (!%p2152_p9)
}
  0x34   :  { %38 = dma.hbm_to_vmem [thread:$0]  %s2677_s2, 128, %s33_s24, [#allocation3], %s2232_s25, %s2232_s25, %s2233_s26  }
  0x35   :  { %s2156_s23 = scalar_lea.hbm %s2683_s8, 256 }
  0x36   :  { %p2157_p10 = scmp.ne.s32.totalorder %s2683_s8, %s2156_s23  ;;  %p2160_p11 = scmp.lt.u32.totalorder %s2156_s23, %s2683_s8 }
  0x38   :  { %p2162_p12 = pnand %p2160_p11, %p2157_p10 }
  0x3a   :  { %2165 = shalt.err (!%p2162_p12)
}
  0x3b   :  { %s2166_s18 = scalar_lea.vmem %s2355_s28, 256  ;;  %p2171_p0 = scmp.lt.s32.totalorder %s2355_s28, %s2355_s28 }
  0x3c   :  { %p2167_p13 = scmp.ne.s32.totalorder %s2355_s28, %s2166_s18  ;;  %p2172_p1 = scmp.lt.s32.totalorder %s2166_s18, %s2166_s18 }
  0x3e   :  { %p2173_p2 = por %p2172_p1, %p2171_p0 }
  0x40   :  { %p2174_p3 = pnand %p2173_p2, %p2167_p13 }
  0x42   :  { %2177 = shalt.err (!%p2174_p3)
}
  0x43   :  { %70 = dma.hbm_to_vmem [thread:$0]  %s2683_s8, 256, %s2355_s28, [#allocation6], %s2232_s25, %s2232_s25, %s2233_s26  }
  0x44   :  { %s2236_s19 = smov [#allocation10]   ;;  %s2178_s16 = scalar_lea.hbm %s2686_s11, 256 }
  0x45   :  { %s90_s20 = sshll.u32 %s2236_s19, 4  ;;  %p2179_p4 = scmp.ne.s32.totalorder %s2686_s11, %s2178_s16  ;;  %s91_s20 = int_to_ptr.vmem [resolvable:$true] %s90_s20 }
  0x46   :  { %p2182_p5 = scmp.lt.u32.totalorder %s2178_s16, %s2686_s11 }
  0x48   :  { %p2184_p6 = pnand %p2182_p5, %p2179_p4 }
  0x4a   :  { %2187 = shalt.err (!%p2184_p6)
}
  0x4b   :  { %s2188_s27 = scalar_lea.vmem %s91_s20, 256  ;;  %p2193_p8 = scmp.lt.s32.totalorder %s91_s20, %s91_s20 }
  0x4c   :  { %p2189_p7 = scmp.ne.s32.totalorder %s91_s20, %s2188_s27  ;;  %p2194_p9 = scmp.lt.s32.totalorder %s2188_s27, %s2188_s27 }
  0x4e   :  { %p2195_p10 = por %p2194_p9, %p2193_p8 }
  0x50   :  { %p2196_p11 = pnand %p2195_p10, %p2189_p7 }
  0x52   :  { %2199 = shalt.err (!%p2196_p11)
}
  0x53   :  { %96 = dma.hbm_to_vmem [thread:$0]  %s2686_s11, 256, %s91_s20, [#allocation9], %s2232_s25, %s2232_s25, %s2233_s26  }
  0x54   :  { %2222 = dma.done.wait [#allocation3], 128  }
  0x55   :  { %2223 = vsyncadd [#allocation3], 4294967168 }
  0x56   :  { %2224 = dma.done.wait [#allocation6], 512  }
  0x57   :  { %2225 = vsyncadd [#allocation6], 4294966784 }
  0x58   :  { %2226 = dma.done.wait [#allocation9], 512  }
  0x59   :  { %2227 = vsyncadd [#allocation9], 4294966784  ;;  %v2237_v0 = vmov 0.0   ;;  %vm2238_vm0 = vmmov 0   ;;  %v2045_v1 = vld [vmem:[%s2679_s4] sm:$0xff]   ;;  %v2046_v2 = vld [vmem:[%s2679_s4 + $0x8] sm:$0xff]  }
  0x5a   :  { %1826 = vmatprep.subr.bf16.mxu1 %v2237_v0  ;;  %1818 = vmatprep.subr.bf16.mxu0 %v2237_v0  ;;  %v2047_v3 = vld [vmem:[%s2678_s3] sm:$0xff]   ;;  %v2431_v5 = vld [vmem:[%s2675_s0 + $0x8] sm:$0xff]  ;;  %vm138_vm1 = vcmask 261120   ;;  %vm346_vm2 = vcmask 64512   ;;  %vm363_vm3 = vcmask 1043456   ;;  %vm586_vm4 = vcmask 130048  }
  0x5b   :  { %1830 = vmatprep.mubr.msk.bf16.mxu1 %vm2238_vm0, %v2237_v0  ;;  %1822 = vmatprep.mubr.msk.bf16.mxu0 %vm2238_vm0, %v2237_v0  ;;  %v2426_v4 = vld [vmem:[%s2675_s0] sm:$0xff]  ;;  %v2048_v6 = vld [vmem:[%s2678_s3 + $0x8] sm:$0xff]   ;;  %vm1235_vm5 = vcmask 523264   ;;  %vm1658_vm6 = vcmask 392192   ;;  %s2240_s7 = smov [#allocation11]  }
  0x5c   :  { %1827 = vmatpush3.bf16.msra.mxu1 %v2045_v1  ;;  %1819 = vmatpush3.bf16.msra.mxu0 %v2047_v3  ;;  %v125_v7 = vpack.c.bf16 %v2431_v5, %v2426_v4  ;;  %v2049_v22 = vld [vmem:[%s2680_s5] sm:$0xff]   ;;  %v2050_v23 = vld [vmem:[%s2680_s5 + $0x8] sm:$0xff]  }
  0x5d   :  { %1828 = vmatprep.subr.bf16.mxu1 %v2237_v0  ;;  %1820 = vmatprep.subr.bf16.mxu0 %v2237_v0  ;;  %v2051_v62 = vld [vmem:[%s2681_s6] sm:$0xff]   ;;  %v2052_v63 = vld [vmem:[%s2681_s6 + $0x8] sm:$0xff]   ;;  %s1668_s6 = sshll.u32 %s2240_s7, 4  ;;  %s1669_s6 = int_to_ptr.vmem [resolvable:$true] %s1668_s6 }
  0x5e   :  { %s2200_s30 = scalar_lea.vmem %s1669_s6, 256  ;;  %p2205_p13 = scmp.lt.s32.totalorder %s1669_s6, %s1669_s6 }
  0x5f   :  { %p2201_p12 = scmp.ne.s32.totalorder %s1669_s6, %s2200_s30  ;;  %p2206_p0 = scmp.lt.s32.totalorder %s2200_s30, %s2200_s30 }
  0x60   :  { %1829 = vmatpush3.bf16.msra.mxu1 %v2046_v2  ;;  %1821 = vmatpush3.bf16.msra.mxu0 %v2048_v6 }
  0x61   :  { %1842 = vmatprep.subr.bf16.mxu1 %v2237_v0  ;;  %1834 = vmatprep.subr.bf16.mxu0 %v2237_v0  ;;  %p2207_p1 = por %p2206_p0, %p2205_p13 }
  0x63   :  { %1831 = vmatmul.mubr.msk.bf16.vlgmr.msra.gmra.mrb[0].mxu1 %vm138_vm1, %v125_v7  ;;  %1823 = vmatmul.mubr.msk.bf16.vlgmr.msra.gmra.mrb[0].mxu0 %vm138_vm1, %v125_v7  ;;  %p2208_p2 = pnand %p2207_p1, %p2201_p12 }
  0x64   :  { %1844 = vmatprep.mubr.msk.bf16.mxu1 %vm2238_vm0, %v2237_v0  ;;  %1838 = vmatprep.mubr.msk.bf16.mxu0 %vm2238_vm0, %v2237_v0 }
  0x65   :  { %1835 = vmatpush3.bf16.msra.mxu0 %v2049_v22 }
  0x66   :  { %1836 = vmatprep.subr.bf16.mxu0 %v2237_v0 }
  0x69   :  { %1837 = vmatpush3.bf16.msra.mxu0 %v2050_v23  ;;  %v2056_v23 = vld [vmem:[#allocation5] sm:$0xff]  }
  0x6a   :  { %1848 = vmatprep.subr.bf16.mxu0 %v2237_v0 }
  0x6c   :  { %1839 = vmatmul.mubr.msk.bf16.vlgmr.msra.gmra.mrb[4].mxu0 %vm138_vm1, %v125_v7 }
  0x6d   :  { %1850 = vmatprep.mubr.msk.bf16.mxu0 %vm2238_vm0, %v2237_v0 }
 0x136   :  { %v233_v8 = vpop.f32.mrb[0].mxu1  ;;  %v176_v12 = vpop.f32.mrb[0].mxu0 }
 0x137   :  { %v298_v9 = vpack.c.bf16 %v233_v8, %v233_v8  ;;  %v1832_v10 = vpop.f32.mrb[1].mxu1  ;;  %v1824_v15 = vpop.f32.mrb[1].mxu0  ;;  %v297_v19 = vpack.c.bf16 %v176_v12, %v176_v12 }
 0x138   :  { %v236_v11 = vpop.f32.mrb[2].mxu1  ;;  %v179_v16 = vpop.f32.mrb[2].mxu0 }
 0x139   :  { %v303_v13 = vsel %vm138_vm1, %v298_v9, 0  ;;  %v1833_v14 = vpop.f32.mrb[3].mxu1  ;;  %v1825_v17 = vpop.f32.mrb[3].mxu0  ;;  %v408_v18 = vpack.c.bf16 %v236_v11, %v236_v11  ;;  %v407_v21 = vpack.c.bf16 %v179_v16, %v179_v16 }
 0x13a   :  { %1843 = vmatpush3.bf16.xpose.msra.mxu1 %v303_v13 }
 0x13b   :  { %1854 = vmatprep.subr.bf16.mxu1 %v2237_v0  ;;  %v413_v20 = vsel %vm138_vm1, %v408_v18, 0 }
 0x13f   :  { %v290_v46 = vpop.f32.mrb[4].mxu0 }
 0x140   :  { %v1840_v47 = vpop.f32.mrb[5].mxu0  ;;  %v359_v49 = vpack.c.bf16 %v290_v46, %v290_v46  ;;  %v2058_v46 = vld [vmem:[%s2684_s9] sm:$0xff]  }
 0x141   :  { %1845 = vmatmul.mubr.msk.bf16.vlgmr.msra.gmra.mrb[4].mxu1 %vm138_vm1, %v297_v19  ;;  %v293_v48 = vpop.f32.mrb[6].mxu0  ;;  %v2495_v19 = vld [vmem:[#allocation2] sm:$0xff]   ;;  %v2059_v47 = vld [vmem:[%s2684_s9 + $0x8] sm:$0xff]  }
 0x142   :  { %1855 = vmatpush3.bf16.xpose.msra.mxu1 %v413_v20  ;;  %1856 = vmatprep.mubr.msk.bf16.mxu1 %vm2238_vm0, %v2237_v0  ;;  %v1841_v50 = vpop.f32.mrb[7].mxu0  ;;  %v365_v51 = vsel %vm363_vm3, %v359_v49, 0  ;;  %v468_v56 = vpack.c.bf16 %v293_v48, %v293_v48  ;;  %v2054_v20 = vld [vmem:[#allocation7] sm:$0xff]  }
 0x143   :  { %1866 = vmatprep.subr.bf16.mxu1 %v2237_v0  ;;  %1849 = vmatpush3.bf16.msra.mxu0 %v365_v51 }
 0x144   :  { %1860 = vmatprep.subr.bf16.mxu0 %v2237_v0  ;;  %v473_v58 = vsel %vm363_vm3, %v468_v56, 0 }
 0x149   :  { %1857 = vmatmul.mubr.msk.bf16.vlgmr.msra.gmra.mrb[8].mxu1 %vm138_vm1, %v407_v21  ;;  %v2055_v21 = vld [vmem:[#allocation7 + $0x8] sm:$0xff]  }
 0x14a   :  { %1870 = vmatprep.mubr.msk.bf16.mxu1 %vm2238_vm0, %v2237_v0  ;;  %1867 = vmatpush3.bf16.msra.mxu1 %v2051_v62 }
 0x14b   :  { %1868 = vmatprep.subr.bf16.mxu1 %v2237_v0 }
 0x14e   :  { %1869 = vmatpush3.bf16.msra.mxu1 %v2052_v63 }
 0x14f   :  { %1880 = vmatprep.subr.bf16.mxu1 %v2237_v0 }
 0x214   :  { %v339_v24 = vpop.f32.mrb[4].mxu1 }
 0x215   :  { %v345_v25 = vmul.f32 0.17677669, %v339_v24  ;;  %v1846_v26 = vpop.f32.mrb[5].mxu1  ;;  %v2057_v24 = vld [vmem:[#allocation5 + $0x8] sm:$0xff]  }
 0x216   :  { %v342_v27 = vpop.f32.mrb[6].mxu1 }
 0x217   :  { %v1847_v28 = vpop.f32.mrb[7].mxu1  ;;  %v347_v29 = vsel %vm346_vm2, %v345_v25, -inf }
 0x218   :  { %348 = vmax.xlane.f32.xlu0 %v347_v29 }
 0x21c   :  { %v449_v30 = vpop.f32.mrb[8].mxu1 }
 0x21d   :  { %v455_v31 = vmul.f32 0.17677669, %v449_v30  ;;  %v1858_v32 = vpop.f32.mrb[9].mxu1 }
 0x21e   :  { %v452_v33 = vpop.f32.mrb[10].mxu1 }
 0x21f   :  { %v1859_v34 = vpop.f32.mrb[11].mxu1  ;;  %v456_v35 = vsel %vm346_vm2, %v455_v31, -inf }
 0x220   :  { %457 = vmax.xlane.f32.xlu0 %v456_v35 }
 0x2a5   :  { %v349_v36 = vpop.xlane.xlu0 %348 }
 0x2a6   :  { %v350_v37 = vsub.f32 %v345_v25, %v349_v36 }
 0x2a8   :  { %v351_v38 = vmul.f32 1.442695, %v350_v37 }
 0x2aa   :  { %2074 = vpow2.f32 %v351_v38 }
 0x2ad   :  { %v458_v39 = vpop.xlane.xlu0 %457 }
 0x2ae   :  { %v459_v40 = vsub.f32 %v455_v31, %v458_v39 }
 0x2b0   :  { %v460_v41 = vmul.f32 1.442695, %v459_v40 }
 0x2b2   :  { %2076 = vpow2.f32 %v460_v41 }
 0x2b4   :  { %v2075_v42 = vpop.eup %2074 }
 0x2b5   :  { %v353_v43 = vsel %vm346_vm2, %v2075_v42, 0.0 }
 0x2b6   :  { %354 = vadd.xlane.f32.xlu1 %v353_v43 }
 0x2bc   :  { %v2077_v44 = vpop.eup %2076 }
 0x2bd   :  { %v462_v45 = vsel %vm346_vm2, %v2077_v44, 0.0 }
 0x2be   :  { %463 = vadd.xlane.f32.xlu1 %v462_v45 }
 0x343   :  { %v355_v52 = vpop.xlane.xlu1 %354 }
 0x344   :  { %2078 = vrcp.f32 %v355_v52 }
 0x34b   :  { %v464_v53 = vpop.xlane.xlu1 %463 }
 0x34c   :  { %2080 = vrcp.f32 %v464_v53 }
 0x34e   :  { %v2079_v54 = vpop.eup %2078 }
 0x34f   :  { %v357_v55 = vmul.f32 %v2079_v54, %v2075_v42 }
 0x351   :  { %v358_v57 = vpack.c.bf16 %v357_v55, %v357_v55 }
 0x353   :  { %1851 = vmatmul.mubr.msk.bf16.vlgmr.msra.gmra.mrb[8].mxu0 %vm346_vm2, %v358_v57 }
 0x354   :  { %1861 = vmatpush3.bf16.msra.mxu0 %v473_v58  ;;  %1862 = vmatprep.mubr.msk.bf16.mxu0 %vm2238_vm0, %v2237_v0 }
 0x355   :  { %1874 = vmatprep.subr.bf16.mxu0 %v2237_v0 }
 0x356   :  { %v2081_v59 = vpop.eup %2080 }
 0x357   :  { %v466_v60 = vmul.f32 %v2081_v59, %v2077_v44 }
 0x359   :  { %v467_v61 = vpack.c.bf16 %v466_v60, %v466_v60 }
 0x35b   :  { %1863 = vmatmul.mubr.msk.bf16.vlgmr.msra.gmra.mrb[12].mxu0 %vm346_vm2, %v467_v61 }
 0x35c   :  { %1876 = vmatprep.mubr.msk.bf16.mxu0 %vm2238_vm0, %v2237_v0 }
 0x426   :  { %v401_v1 = vpop.f32.mrb[8].mxu0 }
 0x427   :  { %v1852_v2 = vpop.f32.mrb[9].mxu0 }
 0x428   :  { %v404_v3 = vpop.f32.mrb[10].mxu0 }
 0x429   :  { %v1853_v6 = vpop.f32.mrb[11].mxu0 }
 0x42e   :  { %v509_v7 = vpop.f32.mrb[12].mxu0 }
 0x42f   :  { %v519_v8 = vpack.c.bf16 %v509_v7, %v401_v1  ;;  %v1864_v9 = vpop.f32.mrb[13].mxu0 }
 0x430   :  { %v512_v10 = vpop.f32.mrb[14].mxu0 }
 0x431   :  { %v1865_v11 = vpop.f32.mrb[15].mxu0  ;;  %1871 = vmatmul.mubr.msk.bf16.vlgmr.msra.gmra.mrb[12].mxu1 %vm138_vm1, %v519_v8 }
 0x432   :  { %1884 = vmatprep.mubr.msk.bf16.mxu1 %vm2238_vm0, %v2237_v0  ;;  %1881 = vmatpush3.bf16.msra.mxu1 %v2056_v23 }
 0x433   :  { %1882 = vmatprep.subr.bf16.mxu1 %v2237_v0 }
 0x436   :  { %1883 = vmatpush3.bf16.msra.mxu1 %v2057_v24  ;;  %v2060_v24 = vld [vmem:[#allocation8] sm:$0xff]  }
 0x437   :  { %1896 = vmatprep.subr.bf16.mxu1 %v2237_v0 }
 0x504   :  { %v569_v12 = vpop.f32.mrb[12].mxu1 }
 0x505   :  { %v1872_v13 = vpop.f32.mrb[13].mxu1  ;;  %v576_v15 = vadd.f32 %v569_v12, %v2426_v4  ;;  %v119_v4 = vld [vmem:[%s2676_s1] sm:$0xff] }
 0x506   :  { %v572_v14 = vpop.f32.mrb[14].mxu1 }
 0x507   :  { %v577_v16 = vadd.f32 %v572_v14, %v2431_v5  ;;  %v1873_v17 = vpop.f32.mrb[15].mxu1  ;;  %v120_v5 = vld [vmem:[%s2676_s1 + $0x8] sm:$0xff] }
 0x508   :  { %v700_v22 = vpack.c.bf16 %v120_v5, %v119_v4 }
 0x509   :  { %v580_v18 = vpack.c.bf16 %v577_v16, %v576_v15 }
 0x50b   :  { %1875 = vmatpush3.bf16.msra.mxu0 %v580_v18 }
 0x50c   :  { %1888 = vmatprep.subr.bf16.mxu0 %v2237_v0 }
 0x50e   :  { %1877 = vmatmul.mubr.msk.bf16.vlgmr.msra.gmra.mrb[16].mxu0 %vm586_vm4, %v2495_v19 }
 0x50f   :  { %1889 = vmatpush3.bf16.msra.mxu0 %v2054_v20  ;;  %1892 = vmatprep.mubr.msk.bf16.mxu0 %vm2238_vm0, %v2237_v0 }
 0x510   :  { %1890 = vmatprep.subr.bf16.mxu0 %v2237_v0 }
 0x513   :  { %1891 = vmatpush3.bf16.msra.mxu0 %v2055_v21 }
 0x514   :  { %1904 = vmatprep.subr.bf16.mxu0 %v2237_v0 }
 0x516   :  { %1893 = vmatmul.mubr.msk.bf16.vlgmr.msra.gmra.mrb[20].mxu0 %vm138_vm1, %v700_v22 }
 0x517   :  { %1906 = vmatprep.mubr.msk.bf16.mxu0 %vm2238_vm0, %v2237_v0 }
 0x5e1   :  { %v2515_v25 = vpop.f32.mrb[16].mxu0 }
 0x5e2   :  { %v1878_v26 = vpop.f32.mrb[17].mxu0  ;;  %v2520_v28 = vsub.f32 %v576_v15, %v2515_v25 }
 0x5e3   :  { %v2517_v27 = vpop.f32.mrb[18].mxu0  ;;  %v2061_v26 = vld [vmem:[#allocation8 + $0x8] sm:$0xff]  }
 0x5e4   :  { %v2523_v29 = vsub.f32 %v577_v16, %v2517_v27  ;;  %v1879_v30 = vpop.f32.mrb[19].mxu0 }
 0x5e6   :  { %v639_v31 = vpack.c.bf16 %v2523_v29, %v2520_v28 }
 0x5e8   :  { %1885 = vmatmul.mubr.msk.bf16.vlgmr.msra.gmra.mrb[16].mxu1 %vm138_vm1, %v639_v31 }
 0x5e9   :  { %v750_v32 = vpop.f32.mrb[20].mxu0  ;;  %1900 = vmatprep.mubr.msk.bf16.mxu1 %vm2238_vm0, %v2237_v0  ;;  %1897 = vmatpush3.bf16.msra.mxu1 %v2058_v46  ;;  %v2062_v46 = vld [vmem:[#allocation10] sm:$0xff]  }
 0x5ea   :  { %v815_v33 = vpack.c.bf16 %v750_v32, %v750_v32  ;;  %v1894_v34 = vpop.f32.mrb[21].mxu0  ;;  %1898 = vmatprep.subr.bf16.mxu1 %v2237_v0 }
 0x5eb   :  { %v753_v35 = vpop.f32.mrb[22].mxu0 }
 0x5ec   :  { %v820_v36 = vsel %vm138_vm1, %v815_v33, 0  ;;  %v1895_v37 = vpop.f32.mrb[23].mxu0  ;;  %v923_v38 = vpack.c.bf16 %v753_v35, %v753_v35 }
 0x5ed   :  { %1905 = vmatpush3.bf16.xpose.msra.mxu0 %v820_v36  ;;  %1899 = vmatpush3.bf16.msra.mxu1 %v2059_v47  ;;  %v2063_v47 = vld [vmem:[#allocation10 + $0x8] sm:$0xff]  }
 0x5ee   :  { %1916 = vmatprep.subr.bf16.mxu0 %v2237_v0  ;;  %v928_v43 = vsel %vm138_vm1, %v923_v38, 0  ;;  %1910 = vmatprep.subr.bf16.mxu1 %v2237_v0 }
 0x5f0   :  { %1901 = vmatmul.mubr.msk.bf16.vlgmr.msra.gmra.mrb[20].mxu1 %vm138_vm1, %v700_v22 }
 0x5f1   :  { %1912 = vmatprep.mubr.msk.bf16.mxu1 %vm2238_vm0, %v2237_v0 }
 0x6bb   :  { %v689_v39 = vpop.f32.mrb[16].mxu1 }
 0x6bc   :  { %v814_v40 = vpack.c.bf16 %v689_v39, %v689_v39  ;;  %v1886_v41 = vpop.f32.mrb[17].mxu1 }
 0x6bd   :  { %v692_v42 = vpop.f32.mrb[18].mxu1 }
 0x6be   :  { %v1887_v44 = vpop.f32.mrb[19].mxu1  ;;  %1907 = vmatmul.mubr.msk.bf16.vlgmr.msra.gmra.mrb[24].mxu0 %vm138_vm1, %v814_v40  ;;  %v922_v45 = vpack.c.bf16 %v692_v42, %v692_v42 }
 0x6bf   :  { %1917 = vmatpush3.bf16.xpose.msra.mxu0 %v928_v43  ;;  %1918 = vmatprep.mubr.msk.bf16.mxu0 %vm2238_vm0, %v2237_v0 }
 0x6c0   :  { %1928 = vmatprep.subr.bf16.mxu0 %v2237_v0 }
 0x6c3   :  { %v807_v9 = vpop.f32.mrb[20].mxu1 }
 0x6c4   :  { %v1902_v10 = vpop.f32.mrb[21].mxu1  ;;  %v875_v12 = vpack.c.bf16 %v807_v9, %v807_v9 }
 0x6c5   :  { %v810_v11 = vpop.f32.mrb[22].mxu1 }
 0x6c6   :  { %1919 = vmatmul.mubr.msk.bf16.vlgmr.msra.gmra.mrb[28].mxu0 %vm138_vm1, %v922_v45  ;;  %v1903_v13 = vpop.f32.mrb[23].mxu1  ;;  %v880_v14 = vsel %vm363_vm3, %v875_v12, 0  ;;  %v983_v20 = vpack.c.bf16 %v810_v11, %v810_v11  ;;  %v2069_v11 = vld [vmem:[%s2688_s13 + $0x18] sm:$0xff]  }
 0x6c7   :  { %1932 = vmatprep.mubr.msk.bf16.mxu0 %vm2238_vm0, %v2237_v0  ;;  %1911 = vmatpush3.bf16.msra.mxu1 %v880_v14 }
 0x6c8   :  { %1922 = vmatprep.subr.bf16.mxu1 %v2237_v0  ;;  %v988_v4 = vsel %vm363_vm3, %v983_v20, 0  ;;  %1929 = vmatpush3.bf16.msra.mxu0 %v2060_v24 }
 0x6c9   :  { %1930 = vmatprep.subr.bf16.mxu0 %v2237_v0 }
 0x6cc   :  { %1931 = vmatpush3.bf16.msra.mxu0 %v2061_v26  ;;  %v2073_v26 = vld [vmem:[%s2688_s13 + $0x28] sm:$0xff]  }
 0x6cd   :  { %1942 = vmatprep.subr.bf16.mxu0 %v2237_v0 }
 0x791   :  { %v856_v48 = vpop.f32.mrb[24].mxu0 }
 0x792   :  { %v862_v49 = vmul.f32 0.17677669, %v856_v48  ;;  %v1908_v50 = vpop.f32.mrb[25].mxu0 }
 0x793   :  { %v859_v51 = vpop.f32.mrb[26].mxu0 }
 0x794   :  { %v1909_v52 = vpop.f32.mrb[27].mxu0  ;;  %v863_v53 = vsel %vm346_vm2, %v862_v49, -inf }
 0x795   :  { %864 = vmax.xlane.f32.xlu0 %v863_v53 }
 0x799   :  { %v964_v54 = vpop.f32.mrb[28].mxu0 }
 0x79a   :  { %v970_v55 = vmul.f32 0.17677669, %v964_v54  ;;  %v1920_v56 = vpop.f32.mrb[29].mxu0 }
 0x79b   :  { %v967_v57 = vpop.f32.mrb[30].mxu0 }
 0x79c   :  { %v1921_v58 = vpop.f32.mrb[31].mxu0  ;;  %v971_v59 = vsel %vm346_vm2, %v970_v55, -inf  ;;  %v2066_v57 = vld [vmem:[%s2687_s12 + $0x10] sm:$0xff]  }
 0x79d   :  { %972 = vmax.xlane.f32.xlu1 %v971_v59 }
 0x822   :  { %v865_v60 = vpop.xlane.xlu0 %864 }
 0x823   :  { %v866_v61 = vsub.f32 %v862_v49, %v865_v60 }
 0x825   :  { %v867_v62 = vmul.f32 1.442695, %v866_v61 }
 0x827   :  { %2082 = vpow2.f32 %v867_v62 }
 0x82a   :  { %v973_v63 = vpop.xlane.xlu1 %972 }
 0x82b   :  { %v974_v1 = vsub.f32 %v970_v55, %v973_v63 }
 0x82d   :  { %v975_v2 = vmul.f32 1.442695, %v974_v1  ;;  %v2068_v1 = vld [vmem:[%s2688_s13 + $0x10] sm:$0xff]  }
 0x82f   :  { %2084 = vpow2.f32 %v975_v2 }
 0x831   :  { %v2083_v3 = vpop.eup %2082 }
 0x832   :  { %v869_v6 = vsel %vm346_vm2, %v2083_v3, 0.0 }
 0x833   :  { %870 = vadd.xlane.f32.xlu0 %v869_v6 }
 0x839   :  { %v2085_v7 = vpop.eup %2084 }
 0x83a   :  { %v977_v8 = vsel %vm346_vm2, %v2085_v7, 0.0 }
 0x83b   :  { %978 = vadd.xlane.f32.xlu1 %v977_v8 }
 0x8c0   :  { %v871_v15 = vpop.xlane.xlu0 %870 }
 0x8c1   :  { %2086 = vrcp.f32 %v871_v15  ;;  %v2070_v15 = vld [vmem:[%s2688_s13] sm:$0xff]  }
 0x8c8   :  { %v979_v16 = vpop.xlane.xlu1 %978 }
 0x8c9   :  { %2088 = vrcp.f32 %v979_v16 }
 0x8cb   :  { %v2087_v17 = vpop.eup %2086 }
 0x8cc   :  { %v873_v18 = vmul.f32 %v2087_v17, %v2083_v3 }
 0x8ce   :  { %v874_v21 = vpack.c.bf16 %v873_v18, %v873_v18 }
 0x8d0   :  { %1913 = vmatmul.mubr.msk.bf16.vlgmr.msra.gmra.mrb[24].mxu1 %vm346_vm2, %v874_v21  ;;  %v2071_v21 = vld [vmem:[%s2688_s13 + $0x8] sm:$0xff]  }
 0x8d1   :  { %1923 = vmatpush3.bf16.msra.mxu1 %v988_v4  ;;  %1924 = vmatprep.mubr.msk.bf16.mxu1 %vm2238_vm0, %v2237_v0 }
 0x8d2   :  { %1936 = vmatprep.subr.bf16.mxu1 %v2237_v0 }
 0x8d3   :  { %v2089_v5 = vpop.eup %2088 }
 0x8d4   :  { %v981_v22 = vmul.f32 %v2089_v5, %v2085_v7 }
 0x8d6   :  { %v982_v23 = vpack.c.bf16 %v981_v22, %v981_v22  ;;  %v2072_v22 = vld [vmem:[%s2688_s13 + $0x20] sm:$0xff]   ;;  %s2239_s13 = smov 32  }
 0x8d8   :  { %1925 = vmatmul.mubr.msk.bf16.vlgmr.msra.gmra.mrb[28].mxu1 %vm346_vm2, %v982_v23 }
 0x8d9   :  { %1938 = vmatprep.mubr.msk.bf16.mxu1 %vm2238_vm0, %v2237_v0 }
 0x9a3   :  { %v916_v30 = vpop.f32.mrb[24].mxu1 }
 0x9a4   :  { %v1914_v31 = vpop.f32.mrb[25].mxu1 }
 0x9a5   :  { %v919_v32 = vpop.f32.mrb[26].mxu1 }
 0x9a6   :  { %v1915_v33 = vpop.f32.mrb[27].mxu1 }
 0x9ab   :  { %v1024_v34 = vpop.f32.mrb[28].mxu1 }
 0x9ac   :  { %v1034_v35 = vpack.c.bf16 %v1024_v34, %v916_v30  ;;  %v1926_v36 = vpop.f32.mrb[29].mxu1 }
 0x9ad   :  { %v1027_v37 = vpop.f32.mrb[30].mxu1 }
 0x9ae   :  { %v1927_v38 = vpop.f32.mrb[31].mxu1  ;;  %1933 = vmatmul.mubr.msk.bf16.vlgmr.msra.gmra.mrb[32].mxu0 %vm138_vm1, %v1034_v35 }
 0x9af   :  { %1946 = vmatprep.mubr.msk.bf16.mxu0 %vm2238_vm0, %v2237_v0  ;;  %1943 = vmatpush3.bf16.msra.mxu0 %v2062_v46 }
 0x9b0   :  { %1944 = vmatprep.subr.bf16.mxu0 %v2237_v0 }
 0x9b3   :  { %1945 = vmatpush3.bf16.msra.mxu0 %v2063_v47 }
 0x9b4   :  { %1962 = vmatprep.subr.bf16.mxu0 %v2237_v0 }
 0xa81   :  { %v1084_v39 = vpop.f32.mrb[32].mxu0 }
 0xa82   :  { %v1934_v40 = vpop.f32.mrb[33].mxu0  ;;  %v1091_v42 = vadd.f32 %v1084_v39, %v2520_v28  ;;  %v2064_v28 = vld [vmem:[%s2687_s12] sm:$0xff]  }
 0xa83   :  { %v1087_v41 = vpop.f32.mrb[34].mxu0 }
 0xa84   :  { %v1092_v43 = vadd.f32 %v1087_v41, %v2523_v29  ;;  %v1935_v44 = vpop.f32.mrb[35].mxu0  ;;  %v2065_v29 = vld [vmem:[%s2687_s12 + $0x8] sm:$0xff]  }
 0xa86   :  { %v1093_v45 = vpack.c.bf16 %v1092_v43, %v1091_v42 }
 0xa88   :  { %1937 = vmatpush3.bf16.msra.mxu1 %v1093_v45 }
 0xa89   :  { %1950 = vmatprep.subr.bf16.mxu1 %v2237_v0 }
 0xa8b   :  { %1939 = vmatmul.mubr.msk.bf16.vlgmr.msra.gmra.mrb[32].mxu1 %vm586_vm4, %v2495_v19 }
 0xa8c   :  { %1958 = vmatprep.mubr.msk.bf16.mxu1 %vm2238_vm0, %v2237_v0  ;;  %1951 = vmatpush3.bf16.msra.mxu1 %v2064_v28 }
 0xa8d   :  { %1952 = vmatprep.subr.bf16.mxu1 %v2237_v0 }
 0xa90   :  { %1953 = vmatpush3.bf16.msra.mxu1 %v2065_v29 }
 0xa91   :  { %1954 = vmatprep.subr.bf16.mxu1 %v2237_v0 }
 0xa94   :  { %1955 = vmatpush3.bf16.msra.mxu1 %v2066_v57 }
 0xa95   :  { %1956 = vmatprep.subr.bf16.mxu1 %v2237_v0 }
 0xb5e   :  { %v1128_v48 = vpop.f32.mrb[32].mxu1 }
 0xb5f   :  { %v1137_v49 = vadd.f32 %v1128_v48, %v2515_v25  ;;  %v1940_v50 = vpop.f32.mrb[33].mxu1  ;;  %v1135_v52 = vsub.f32 %v1091_v42, %v1128_v48  ;;  %v2067_v25 = vld [vmem:[%s2687_s12 + $0x18] sm:$0xff]  }
 0xb60   :  { %v1131_v51 = vpop.f32.mrb[34].mxu1  ;;  %1957 = vmatpush3.bf16.msra.mxu1 %v2067_v25 }
 0xb61   :  { %v1136_v53 = vsub.f32 %v1092_v43, %v1131_v51  ;;  %v1138_v54 = vadd.f32 %v1131_v51, %v2517_v27  ;;  %v1941_v55 = vpop.f32.mrb[35].mxu1  ;;  %1992 = vmatprep.subr.bf16.mxu1 %v2237_v0 }
 0xb63   :  { %v1143_v56 = vpack.c.bf16 %v1136_v53, %v1135_v52 }
 0xb65   :  { %1947 = vmatmul.mubr.msk.bf16.vlgmr.msra.gmra.mrb[36].mxu0 %vm138_vm1, %v1143_v56 }
 0xb66   :  { %1964 = vmatprep.mubr.msk.bf16.mxu0 %vm2238_vm0, %v2237_v0 }
 0xc38   :  { %v1193_v27 = vpop.f32.mrb[36].mxu0 }
 0xc39   :  { %v1948_v58 = vpop.f32.mrb[37].mxu0  ;;  %v1200_v60 = vmax.f32 %v1193_v27, 0.0 }
 0xc3a   :  { %v1196_v59 = vpop.f32.mrb[38].mxu0 }
 0xc3b   :  { %v1201_v61 = vmax.f32 %v1196_v59, 0.0  ;;  %v1949_v62 = vpop.f32.mrb[39].mxu0 }
 0xc3d   :  { %v1210_v63 = vpack.c.bf16 %v1201_v61, %v1200_v60 }
 0xc3f   :  { %1959 = vmatmul.mubr.msk.bf16.vlgmr.msra.gmra.mrb[36].mxu1 %vm1235_vm5, %v1210_v63 }
 0xc40   :  { %1996 = vmatprep.mubr.msk.bf16.mxu1 %vm2238_vm0, %v2237_v0  ;;  %1993 = vmatpush3.bf16.msra.mxu1 %v2068_v1 }
 0xc41   :  { %1994 = vmatprep.subr.bf16.mxu1 %v2237_v0 }
 0xc44   :  { %1995 = vmatpush3.bf16.msra.mxu1 %v2069_v11 }
 0xc45   :  { %2000 = vmatprep.subr.bf16.mxu1 %v2237_v0 }
 0xd12   :  { %v1273_v2 = vpop.f32.mrb[36].mxu1 }
 0xd13   :  { %v1960_v3 = vpop.f32.mrb[37].mxu1  ;;  %v2606_v7 = vadd.f32 %v1273_v2, %v1135_v52 }
 0xd14   :  { %v1276_v6 = vpop.f32.mrb[38].mxu1 }
 0xd15   :  { %v2608_v8 = vadd.f32 %v1276_v6, %v1136_v53  ;;  %v1961_v9 = vpop.f32.mrb[39].mxu1 }
 0xd17   :  { %v1282_v10 = vpack.c.bf16 %v2608_v8, %v2606_v7 }
 0xd19   :  { %1963 = vmatpush3.bf16.msra.mxu0 %v1282_v10 }
 0xd1a   :  { %1968 = vmatprep.subr.bf16.mxu0 %v2237_v0 }
 0xd1c   :  { %1965 = vmatmul.mubr.msk.bf16.vlgmr.msra.gmra.mrb[40].mxu0 %vm586_vm4, %v2495_v19 }
 0xd1d   :  { %1969 = vmatpush3.bf16.msra.mxu0 %v2068_v1  ;;  %1972 = vmatprep.mubr.msk.bf16.mxu0 %vm2238_vm0, %v2237_v0 }
 0xd1e   :  { %1970 = vmatprep.subr.bf16.mxu0 %v2237_v0 }
 0xd21   :  { %1971 = vmatpush3.bf16.msra.mxu0 %v2069_v11 }
 0xd22   :  { %1976 = vmatprep.subr.bf16.mxu0 %v2237_v0 }
 0xdef   :  { %v1317_v12 = vpop.f32.mrb[40].mxu0 }
 0xdf0   :  { %v1326_v13 = vadd.f32 %v1317_v12, %v1137_v49  ;;  %v1966_v14 = vpop.f32.mrb[41].mxu0  ;;  %v1324_v41 = vsub.f32 %v2606_v7, %v1317_v12 }
 0xdf1   :  { %v2623_v19 = vpop.f32.mrb[42].mxu0 }
 0xdf2   :  { %v1340_v16 = vpack.c.bf16 %v1326_v13, %v1326_v13  ;;  %v1967_v17 = vpop.f32.mrb[43].mxu0  ;;  %v1327_v18 = vadd.f32 %v2623_v19, %v1138_v54  ;;  %v1328_v4 = vrot.slane %v1326_v13, 7  ;;  %v1329_v30 = vrot.slane %v1326_v13, 1 }
 0xdf3   :  { %v1325_v44 = vsub.f32 %v2608_v8, %v2623_v19 }
 0xdf4   :  { %1973 = vmatmul.mubr.msk.bf16.vlgmr.msra.gmra.mrb[44].mxu0 %vm138_vm1, %v1340_v16  ;;  %v1516_v20 = vpack.c.bf16 %v1327_v18, %v1327_v18  ;;  %v1513_v5 = vrot.slane %v1327_v18, 7  ;;  %v1334_v23 = vpack.c.bf16 %v1328_v4, %v1328_v4  ;;  %v1514_v31 = vrot.slane %v1327_v18, 1 }
 0xdf5   :  { %1977 = vmatpush3.bf16.msra.mxu0 %v2070_v15  ;;  %1980 = vmatprep.mubr.msk.bf16.mxu0 %vm2238_vm0, %v2237_v0  ;;  %v1456_v32 = vpack.c.bf16 %v1329_v30, %v1329_v30 }
 0xdf6   :  { %1978 = vmatprep.subr.bf16.mxu0 %v2237_v0  ;;  %1997 = vmatmul.mubr.msk.bf16.vlgmr.msra.gmra.mrb[40].mxu1 %vm138_vm1, %v1516_v20  ;;  %v1515_v24 = vpack.c.bf16 %v1513_v5, %v1513_v5  ;;  %v1603_v33 = vpack.c.bf16 %v1514_v31, %v1514_v31 }
 0xdf7   :  { %2001 = vmatpush3.bf16.msra.mxu1 %v2070_v15  ;;  %2004 = vmatprep.mubr.msk.bf16.mxu1 %vm2238_vm0, %v2237_v0 }
 0xdf8   :  { %2002 = vmatprep.subr.bf16.mxu1 %v2237_v0 }
 0xdf9   :  { %1979 = vmatpush3.bf16.msra.mxu0 %v2071_v21 }
 0xdfa   :  { %1984 = vmatprep.subr.bf16.mxu0 %v2237_v0 }
 0xdfb   :  { %2003 = vmatpush3.bf16.msra.mxu1 %v2071_v21 }
 0xdfc   :  { %2008 = vmatprep.subr.bf16.mxu1 %v2237_v0 }
 0xe00   :  { %1981 = vmatmul.mubr.msk.bf16.vlgmr.msra.gmra.mrb[44].mxu0 %vm138_vm1, %v1334_v23 }
 0xe01   :  { %1985 = vmatpush3.bf16.msra.mxu0 %v2072_v22  ;;  %1988 = vmatprep.mubr.msk.bf16.mxu0 %vm2238_vm0, %v2237_v0 }
 0xe02   :  { %1986 = vmatprep.subr.bf16.mxu0 %v2237_v0  ;;  %2005 = vmatmul.mubr.msk.bf16.vlgmr.msra.gmra.mrb[40].mxu1 %vm138_vm1, %v1515_v24 }
 0xe03   :  { %2009 = vmatpush3.bf16.msra.mxu1 %v2072_v22  ;;  %2012 = vmatprep.mubr.msk.bf16.mxu1 %vm2238_vm0, %v2237_v0 }
 0xe04   :  { %2010 = vmatprep.subr.bf16.mxu1 %v2237_v0 }
 0xe05   :  { %1987 = vmatpush3.bf16.msra.mxu0 %v2073_v26 }
 0xe07   :  { %2011 = vmatpush3.bf16.msra.mxu1 %v2073_v26 }
 0xe0c   :  { %1989 = vmatmul.mubr.msk.bf16.vlgmr.msra.gmra.mrb[44].mxu0 %vm138_vm1, %v1456_v32 }
 0xe0e   :  { %2013 = vmatmul.mubr.msk.bf16.vlgmr.msra.gmra.mrb[40].mxu1 %vm138_vm1, %v1603_v33 }
 0xedf   :  { %v1506_v34 = vpop.f32.mrb[44].mxu0 }
 0xee0   :  { %1650 = vrot.lane.b32.xlu0 %v1506_v34, %s2239_s13  ;;  %v1990_v35 = vpop.f32.mrb[45].mxu0 }
 0xee1   :  { %v1509_v36 = vpop.f32.mrb[46].mxu0  ;;  %v1641_v37 = vpop.f32.mrb[40].mxu1 }
 0xee2   :  { %v1991_v38 = vpop.f32.mrb[47].mxu0  ;;  %1652 = vrot.lane.b32.xlu1 %v1641_v37, %s2239_s13  ;;  %v2014_v39 = vpop.f32.mrb[41].mxu1 }
 0xee3   :  { %v1644_v40 = vpop.f32.mrb[42].mxu1 }
 0xee4   :  { %v2015_v0 = vpop.f32.mrb[43].mxu1 }
 0xf52   :  { %v1651_v42 = vpop.permute.xlu0 %1650 }
 0xf53   :  { %v1656_v43 = vsel %vm138_vm1, %v1324_v41, %v1651_v42 }
 0xf54   :  { %v1659_v45 = vsel %vm1658_vm6, %v1656_v43, 0.0  ;;  %v1653_v46 = vpop.permute.xlu1 %1652 }
 0xf55   :  { %1661 = vst [vmem:[#allocation11] sm:$0xff] %v1659_v45  ;;  %v1657_v47 = vsel %vm138_vm1, %v1325_v44, %v1653_v46 }
 0xf56   :  { %v1660_v28 = vsel %vm1658_vm6, %v1657_v47, 0.0 }
 0xf57   :  { %1662 = vst [vmem:[#allocation11 + $0x8] sm:$0xff] %v1660_v28 }
 0xf58   :  { %2211 = shalt.err (!%p2208_p2)
}
 0xf59   :  { %s2212_s1 = scalar_lea.hbm %s2689_s14, 256 }
 0xf5a   :  { %p2213_p3 = scmp.ne.s32.totalorder %s2689_s14, %s2212_s1  ;;  %p2216_p4 = scmp.lt.u32.totalorder %s2212_s1, %s2689_s14 }
 0xf5c   :  { %p2218_p5 = pnand %p2216_p4, %p2213_p3 }
 0xf5e   :  { %2221 = shalt.err (!%p2218_p5)
}
 0xf5f   :  { %s2241_s11 = smov 128   ;;  %s2242_s25 = smov 8  }
 0xf60   :  { %1674 = dma.vmem_to_hbm [thread:$0]  %s1669_s6, 256, %s2689_s14, [#allocation4], %s2241_s11, %s2241_s11, %s2242_s25  }
 0xf61   :  { %2228 = dma.done.wait [#allocation4], 256  }
 0xf62   :  { %2229 = vsyncadd [#allocation4], 4294967040 }
 0xf63   :  { %1678 = vsyncpa [#allocation3], 1 }
 0xf64   :  { %1679 = vsyncpa [#allocation6], 1 }
 0xf65   :  { %1680 = vsyncpa [#allocation9], 1 }
 0xf66   :  { %1681 = vsyncpa [#allocation4], 1 }

</bundles_post_ra>
